<compile_context>
chip_gen: v7x
topology: tpu7x:2x2x1
jax: 0.10.0
libtpu: 0.0.40
codegen_flags: <defaults>
</compile_context>

<pallas_src>
import functools

import jax
import jax.numpy as jnp
from jax.experimental import pallas as pl
from jax.experimental.pallas import tpu as pltpu

LANE = 128       # vreg lane width
SUBLANE = 8      # vreg sublane count (f32)
MAX_BM = 512     # default batch tile; sweep {512, 1024} (1024 recommended on v7x)


def _round_up(n, m):
    return ((n + m - 1) // m) * m


def _cdiv(a, b):
    return (a + b - 1) // b


def _prelu(h, a):
    # PReLU with a single scalar slope (torch default num_parameters=1).
    return jnp.where(h > 0, h, a * h)


def mlp_kernel(alpha_ref,                                   # SMEM (4,) PReLU slopes
               x_ref,                                       # VMEM (bm, x_dim) f32
               w1, b1, w2, b2, w3, b3, w4, b4, w5, b5,      # VMEM weights/biases
               o_ref):                                      # VMEM (bm, h_dim) f32
    # Weights may be bf16; every matmul accumulates in f32 on the MXU and all
    # element-wise math (bias add, PReLU) is done in f32 (v5e VPU has no bf16).
    cdt = w1.dtype

    h = jnp.dot(x_ref[...].astype(cdt), w1[...],
                preferred_element_type=jnp.float32) + b1[...]
    h = _prelu(h, alpha_ref[0])

    h = jnp.dot(h.astype(cdt), w2[...], preferred_element_type=jnp.float32) + b2[...]
    h = _prelu(h, alpha_ref[1])

    h = jnp.dot(h.astype(cdt), w3[...], preferred_element_type=jnp.float32) + b3[...]
    h = _prelu(h, alpha_ref[2])

    h = jnp.dot(h.astype(cdt), w4[...], preferred_element_type=jnp.float32) + b4[...]
    h = _prelu(h, alpha_ref[3])

    h = jnp.dot(h.astype(cdt), w5[...], preferred_element_type=jnp.float32) + b5[...]

    o_ref[...] = h.astype(o_ref.dtype)


def make_params(key, x_dim, H, h_dim, dtype=jnp.float32):
    """Deterministic synthetic parameters matching the torch module's shapes."""
    dims = [(x_dim, H), (H, H), (H, H), (H, H), (H, h_dim)]
    Ws, bs = [], []
    for i, (din, dout) in enumerate(dims):
        kw, kb = jax.random.split(jax.random.fold_in(key, i))
        scale = 1.0 / jnp.sqrt(jnp.float32(din))
        # stored as (in, out) == torch weight (out, in) transposed
        Ws.append(jax.random.uniform(kw, (din, dout), dtype, -1.0, 1.0) * scale)
        bs.append(jax.random.uniform(kb, (1, dout), dtype, -1.0, 1.0) * scale)
    alphas = jnp.full((4,), 0.25, dtype=jnp.float32)   # torch PReLU default init
    return Ws, bs, alphas


def prepare_params(Ws, bs, alphas, compute_dtype=jnp.bfloat16):
    """One-time weight prep (hoisted out of the jitted forward):
       * hidden dims zero-padded to 128 lanes (input dim of layer 0 and output
         dim of the last layer stay unpadded),
       * weights cast to the MXU operand dtype, biases kept f32."""
    n = len(Ws)
    Wp_list, bp_list = [], []
    for i, (W, b) in enumerate(zip(Ws, bs)):
        din, dout = W.shape
        dip = din if i == 0 else _round_up(din, LANE)
        dop = dout if i == n - 1 else _round_up(dout, LANE)
        Wp = jnp.pad(W, ((0, dip - din), (0, dop - dout))).astype(compute_dtype)
        bp = jnp.pad(b, ((0, 0), (0, dop - dout))).astype(jnp.float32)
        Wp_list.append(Wp)
        bp_list.append(bp)
    return tuple(Wp_list), tuple(bp_list), alphas.astype(jnp.float32)


@functools.partial(jax.jit, static_argnames=("max_bm",))
def encoder_forward(x, Wp, bp, alphas, max_bm=MAX_BM):
    B, x_dim = x.shape
    h_dim = Wp[-1].shape[1]

    # ---- batch tiling ----
    # Single tile for small batches; otherwise a capped tile that guarantees at
    # least 2 grid blocks so the "parallel" axis can shard across both
    # TensorCores on v7x.
    if B <= max_bm:
        bm = _round_up(B, SUBLANE)
    else:
        bm = min(max_bm, _round_up(_cdiv(B, 2), SUBLANE))
    Bp = _round_up(B, bm)

    # Pad the batch only if needed (lane dim stays unpadded -- no wrapper pass).
    xp = x if Bp == B else jnp.pad(x, ((0, Bp - B), (0, 0)))

    in_specs = [pl.BlockSpec(memory_space=pltpu.SMEM),              # PReLU slopes
                pl.BlockSpec((bm, x_dim), lambda i: (i, 0))]        # x batch tile
    weight_args = []
    for W, b in zip(Wp, bp):
        weight_args.extend([W, b])
        # Constant index maps: same weight block every grid step (VMEM-resident).
        in_specs.append(pl.BlockSpec(W.shape, lambda i: (0, 0)))
        in_specs.append(pl.BlockSpec(b.shape, lambda i: (0, 0)))

    out_specs = pl.BlockSpec((bm, h_dim), lambda i: (i, 0))

    out = pl.pallas_call(
        mlp_kernel,
        out_shape=jax.ShapeDtypeStruct((Bp, h_dim), jnp.float32),
        grid=(Bp // bm,),
        in_specs=in_specs,
        out_specs=out_specs,
        compiler_params=pltpu.CompilerParams(
            dimension_semantics=("parallel",),
            vmem_limit_bytes=32 * 1024 * 1024),
    )(alphas, xp, *weight_args)

    # Only strip batch padding when it was actually added (usually a no-op).
    return out if Bp == B else out[:B]


def reference_forward(x, Ws, bs, alphas):
    h = x.astype(jnp.float32)
    for i, (W, b) in enumerate(zip(Ws, bs)):
        h = h @ W + b
        if i < 4:
            h = jnp.where(h > 0, h, alphas[i] * h)
    return h


if __name__ == "__main__":
    # Small shapes consistent with the module: params = {H_dim, h_dim, x_dim}
    batch, x_dim, H, h_dim = 8, 32, 64, 16

    key = jax.random.PRNGKey(0)
    kx, kp = jax.random.split(key)
    x = jax.random.normal(kx, (batch, x_dim), dtype=jnp.float32)
    Ws, bs, alphas = make_params(kp, x_dim, H, h_dim)

    # bf16-operand / f32-accumulate MXU path (recommended default on v6e / v7x).
    Wp16, bp16, a16 = prepare_params(Ws, bs, alphas, compute_dtype=jnp.bfloat16)
    out_bf16 = jax.block_until_ready(encoder_forward(x, Wp16, bp16, a16))

    # Exact-semantics f32 path (validation only).
    Wp32, bp32, a32 = prepare_params(Ws, bs, alphas, compute_dtype=jnp.float32)
    out_f32 = jax.block_until_ready(encoder_forward(x, Wp32, bp32, a32))

    ref = reference_forward(x, Ws, bs, alphas)
    assert out_f32.shape == (batch, h_dim), out_f32.shape
    assert out_bf16.shape == (batch, h_dim), out_bf16.shape
    assert jnp.allclose(out_f32, ref, atol=1e-4, rtol=1e-4), (
        float(jnp.max(jnp.abs(out_f32 - ref))))
    assert jnp.allclose(out_bf16, ref, atol=5e-2, rtol=5e-2), (
        float(jnp.max(jnp.abs(out_bf16 - ref))))

    print("KERNEL_OK")
</pallas_src>

<mosaic_0001>
module attributes {stable_mosaic.version = 11 : i64} {
  func.func @mlp_kernel(%arg0: i32, %arg1: memref<4xf32, #tpu.memory_space<smem>>, %arg2: memref<8x32xf32, #tpu.memory_space<vmem>>, %arg3: memref<32x128xbf16, #tpu.memory_space<vmem>>, %arg4: memref<1x128xf32, #tpu.memory_space<vmem>>, %arg5: memref<128x128xbf16, #tpu.memory_space<vmem>>, %arg6: memref<1x128xf32, #tpu.memory_space<vmem>>, %arg7: memref<128x128xbf16, #tpu.memory_space<vmem>>, %arg8: memref<1x128xf32, #tpu.memory_space<vmem>>, %arg9: memref<128x128xbf16, #tpu.memory_space<vmem>>, %arg10: memref<1x128xf32, #tpu.memory_space<vmem>>, %arg11: memref<128x16xbf16, #tpu.memory_space<vmem>>, %arg12: memref<1x16xf32, #tpu.memory_space<vmem>>, %arg13: memref<8x16xf32, #tpu.memory_space<vmem>>) attributes {dimension_semantics = [#tpu.dimension_semantics<parallel>], iteration_bounds = array<i64: 1>, scalar_prefetch = 0 : i64, scratch_operands = 0 : i64, tpu.core_type = #tpu.core_type<tc>, window_params = [{transform_indices = @transform_0, window_bounds = array<i64: 4>}, {transform_indices = @transform_1, window_bounds = array<i64: 8, 32>}, {pipeline_mode = #tpu.pipeline_mode<synchronous>, transform_indices = @transform_2, window_bounds = array<i64: 32, 128>}, {pipeline_mode = #tpu.pipeline_mode<synchronous>, transform_indices = @transform_3, window_bounds = array<i64: 1, 128>}, {pipeline_mode = #tpu.pipeline_mode<synchronous>, transform_indices = @transform_4, window_bounds = array<i64: 128, 128>}, {pipeline_mode = #tpu.pipeline_mode<synchronous>, transform_indices = @transform_5, window_bounds = array<i64: 1, 128>}, {pipeline_mode = #tpu.pipeline_mode<synchronous>, transform_indices = @transform_6, window_bounds = array<i64: 128, 128>}, {pipeline_mode = #tpu.pipeline_mode<synchronous>, transform_indices = @transform_7, window_bounds = array<i64: 1, 128>}, {pipeline_mode = #tpu.pipeline_mode<synchronous>, transform_indices = @transform_8, window_bounds = array<i64: 128, 128>}, {pipeline_mode = #tpu.pipeline_mode<synchronous>, transform_indices = @transform_9, window_bounds = array<i64: 1, 128>}, {pipeline_mode = #tpu.pipeline_mode<synchronous>, transform_indices = @transform_10, window_bounds = array<i64: 128, 16>}, {pipeline_mode = #tpu.pipeline_mode<synchronous>, transform_indices = @transform_11, window_bounds = array<i64: 1, 16>}, {transform_indices = @transform_12, window_bounds = array<i64: 8, 16>}]} {
    %c0 = arith.constant 0 : index
    %c0_0 = arith.constant 0 : index
    %0 = vector.load %arg2[%c0, %c0_0] : memref<8x32xf32, #tpu.memory_space<vmem>>, vector<8x32xf32>
    %1 = arith.truncf %0 : vector<8x32xf32> to vector<8x32xbf16>
    %c0_1 = arith.constant 0 : index
    %c0_2 = arith.constant 0 : index
    %2 = vector.load %arg3[%c0_1, %c0_2] : memref<32x128xbf16, #tpu.memory_space<vmem>>, vector<32x128xbf16>
    %cst = arith.constant dense<0.000000e+00> : vector<8x128xf32>
    %3 = tpu.matmul %1, %2, %cst {dimension_numbers = #tpu.dot_dimension_numbers<[1], [0], [0], [1], [0, 0, 1, 1], [], []>} : vector<8x32xbf16>, vector<32x128xbf16>, vector<8x128xf32> -> vector<8x128xf32>
    %c0_3 = arith.constant 0 : index
    %c0_4 = arith.constant 0 : index
    %4 = vector.load %arg4[%c0_3, %c0_4] : memref<1x128xf32, #tpu.memory_space<vmem>>, vector<1x128xf32>
    %5 = vector.broadcast %4 : vector<1x128xf32> to vector<8x128xf32>
    %6 = arith.addf %3, %5 : vector<8x128xf32>
    %c0_5 = arith.constant 0 : index
    %7 = memref.load %arg1[%c0_5] : memref<4xf32, #tpu.memory_space<smem>>
    %cst_6 = arith.constant 0.000000e+00 : f32
    %8 = vector.broadcast %cst_6 : f32 to vector<8x128xf32>
    %9 = arith.cmpf ogt, %6, %8 : vector<8x128xf32>
    %10 = vector.broadcast %7 : f32 to vector<8x128xf32>
    %11 = arith.mulf %10, %6 : vector<8x128xf32>
    %12 = arith.select %9, %6, %11 : vector<8x128xi1>, vector<8x128xf32>
    %13 = arith.truncf %12 : vector<8x128xf32> to vector<8x128xbf16>
    %c0_7 = arith.constant 0 : index
    %c0_8 = arith.constant 0 : index
    %14 = vector.load %arg5[%c0_7, %c0_8] : memref<128x128xbf16, #tpu.memory_space<vmem>>, vector<128x128xbf16>
    %cst_9 = arith.constant dense<0.000000e+00> : vector<8x128xf32>
    %15 = tpu.matmul %13, %14, %cst_9 {dimension_numbers = #tpu.dot_dimension_numbers<[1], [0], [0], [1], [0, 0, 1, 1], [], []>} : vector<8x128xbf16>, vector<128x128xbf16>, vector<8x128xf32> -> vector<8x128xf32>
    %c0_10 = arith.constant 0 : index
    %c0_11 = arith.constant 0 : index
    %16 = vector.load %arg6[%c0_10, %c0_11] : memref<1x128xf32, #tpu.memory_space<vmem>>, vector<1x128xf32>
    %17 = vector.broadcast %16 : vector<1x128xf32> to vector<8x128xf32>
    %18 = arith.addf %15, %17 : vector<8x128xf32>
    %c1 = arith.constant 1 : index
    %19 = memref.load %arg1[%c1] : memref<4xf32, #tpu.memory_space<smem>>
    %cst_12 = arith.constant 0.000000e+00 : f32
    %20 = vector.broadcast %cst_12 : f32 to vector<8x128xf32>
    %21 = arith.cmpf ogt, %18, %20 : vector<8x128xf32>
    %22 = vector.broadcast %19 : f32 to vector<8x128xf32>
    %23 = arith.mulf %22, %18 : vector<8x128xf32>
    %24 = arith.select %21, %18, %23 : vector<8x128xi1>, vector<8x128xf32>
    %25 = arith.truncf %24 : vector<8x128xf32> to vector<8x128xbf16>
    %c0_13 = arith.constant 0 : index
    %c0_14 = arith.constant 0 : index
    %26 = vector.load %arg7[%c0_13, %c0_14] : memref<128x128xbf16, #tpu.memory_space<vmem>>, vector<128x128xbf16>
    %cst_15 = arith.constant dense<0.000000e+00> : vector<8x128xf32>
    %27 = tpu.matmul %25, %26, %cst_15 {dimension_numbers = #tpu.dot_dimension_numbers<[1], [0], [0], [1], [0, 0, 1, 1], [], []>} : vector<8x128xbf16>, vector<128x128xbf16>, vector<8x128xf32> -> vector<8x128xf32>
    %c0_16 = arith.constant 0 : index
    %c0_17 = arith.constant 0 : index
    %28 = vector.load %arg8[%c0_16, %c0_17] : memref<1x128xf32, #tpu.memory_space<vmem>>, vector<1x128xf32>
    %29 = vector.broadcast %28 : vector<1x128xf32> to vector<8x128xf32>
    %30 = arith.addf %27, %29 : vector<8x128xf32>
    %c2 = arith.constant 2 : index
    %31 = memref.load %arg1[%c2] : memref<4xf32, #tpu.memory_space<smem>>
    %cst_18 = arith.constant 0.000000e+00 : f32
    %32 = vector.broadcast %cst_18 : f32 to vector<8x128xf32>
    %33 = arith.cmpf ogt, %30, %32 : vector<8x128xf32>
    %34 = vector.broadcast %31 : f32 to vector<8x128xf32>
    %35 = arith.mulf %34, %30 : vector<8x128xf32>
    %36 = arith.select %33, %30, %35 : vector<8x128xi1>, vector<8x128xf32>
    %37 = arith.truncf %36 : vector<8x128xf32> to vector<8x128xbf16>
    %c0_19 = arith.constant 0 : index
    %c0_20 = arith.constant 0 : index
    %38 = vector.load %arg9[%c0_19, %c0_20] : memref<128x128xbf16, #tpu.memory_space<vmem>>, vector<128x128xbf16>
    %cst_21 = arith.constant dense<0.000000e+00> : vector<8x128xf32>
    %39 = tpu.matmul %37, %38, %cst_21 {dimension_numbers = #tpu.dot_dimension_numbers<[1], [0], [0], [1], [0, 0, 1, 1], [], []>} : vector<8x128xbf16>, vector<128x128xbf16>, vector<8x128xf32> -> vector<8x128xf32>
    %c0_22 = arith.constant 0 : index
    %c0_23 = arith.constant 0 : index
    %40 = vector.load %arg10[%c0_22, %c0_23] : memref<1x128xf32, #tpu.memory_space<vmem>>, vector<1x128xf32>
    %41 = vector.broadcast %40 : vector<1x128xf32> to vector<8x128xf32>
    %42 = arith.addf %39, %41 : vector<8x128xf32>
    %c3 = arith.constant 3 : index
    %43 = memref.load %arg1[%c3] : memref<4xf32, #tpu.memory_space<smem>>
    %cst_24 = arith.constant 0.000000e+00 : f32
    %44 = vector.broadcast %cst_24 : f32 to vector<8x128xf32>
    %45 = arith.cmpf ogt, %42, %44 : vector<8x128xf32>
    %46 = vector.broadcast %43 : f32 to vector<8x128xf32>
    %47 = arith.mulf %46, %42 : vector<8x128xf32>
    %48 = arith.select %45, %42, %47 : vector<8x128xi1>, vector<8x128xf32>
    %49 = arith.truncf %48 : vector<8x128xf32> to vector<8x128xbf16>
    %c0_25 = arith.constant 0 : index
    %c0_26 = arith.constant 0 : index
    %50 = vector.load %arg11[%c0_25, %c0_26] : memref<128x16xbf16, #tpu.memory_space<vmem>>, vector<128x16xbf16>
    %cst_27 = arith.constant dense<0.000000e+00> : vector<8x16xf32>
    %51 = tpu.matmul %49, %50, %cst_27 {dimension_numbers = #tpu.dot_dimension_numbers<[1], [0], [0], [1], [0, 0, 1, 1], [], []>} : vector<8x128xbf16>, vector<128x16xbf16>, vector<8x16xf32> -> vector<8x16xf32>
    %c0_28 = arith.constant 0 : index
    %c0_29 = arith.constant 0 : index
    %52 = vector.load %arg12[%c0_28, %c0_29] : memref<1x16xf32, #tpu.memory_space<vmem>>, vector<1x16xf32>
    %53 = vector.broadcast %52 : vector<1x16xf32> to vector<8x16xf32>
    %54 = arith.addf %51, %53 : vector<8x16xf32>
    %c0_30 = arith.constant 0 : index
    %c0_31 = arith.constant 0 : index
    %55 = vector.load %arg13[%c0_30, %c0_31] : memref<8x16xf32, #tpu.memory_space<vmem>>, vector<8x16xf32>
    tpu.vector_store %arg13[%c0_30, %c0_31], %54 {strides = array<i32>} : memref<8x16xf32, #tpu.memory_space<vmem>>, vector<8x16xf32>,
    return
  }
  func.func @transform_0(%arg0: i32) -> i32 {
    %c0_i32 = arith.constant 0 : i32
    %c0_i32_0 = arith.constant 0 : i32
    return %c0_i32 : i32
  }
  func.func @transform_1(%arg0: i32) -> (i32, i32) {
    %c0_i32 = arith.constant 0 : i32
    %c0_i32_0 = arith.constant 0 : i32
    return %arg0, %c0_i32 : i32, i32
  }
  func.func @transform_2(%arg0: i32) -> (i32, i32) {
    %c0_i32 = arith.constant 0 : i32
    %c0_i32_0 = arith.constant 0 : i32
    %c0_i32_1 = arith.constant 0 : i32
    return %c0_i32, %c0_i32_0 : i32, i32
  }
  func.func @transform_3(%arg0: i32) -> (i32, i32) {
    %c0_i32 = arith.constant 0 : i32
    %c0_i32_0 = arith.constant 0 : i32
    %c0_i32_1 = arith.constant 0 : i32
    return %c0_i32, %c0_i32_0 : i32, i32
  }
  func.func @transform_4(%arg0: i32) -> (i32, i32) {
    %c0_i32 = arith.constant 0 : i32
    %c0_i32_0 = arith.constant 0 : i32
    %c0_i32_1 = arith.constant 0 : i32
    return %c0_i32, %c0_i32_0 : i32, i32
  }
  func.func @transform_5(%arg0: i32) -> (i32, i32) {
    %c0_i32 = arith.constant 0 : i32
    %c0_i32_0 = arith.constant 0 : i32
    %c0_i32_1 = arith.constant 0 : i32
    return %c0_i32, %c0_i32_0 : i32, i32
  }
  func.func @transform_6(%arg0: i32) -> (i32, i32) {
    %c0_i32 = arith.constant 0 : i32
    %c0_i32_0 = arith.constant 0 : i32
    %c0_i32_1 = arith.constant 0 : i32
    return %c0_i32, %c0_i32_0 : i32, i32
  }
  func.func @transform_7(%arg0: i32) -> (i32, i32) {
    %c0_i32 = arith.constant 0 : i32
    %c0_i32_0 = arith.constant 0 : i32
    %c0_i32_1 = arith.constant 0 : i32
    return %c0_i32, %c0_i32_0 : i32, i32
  }
  func.func @transform_8(%arg0: i32) -> (i32, i32) {
    %c0_i32 = arith.constant 0 : i32
    %c0_i32_0 = arith.constant 0 : i32
    %c0_i32_1 = arith.constant 0 : i32
    return %c0_i32, %c0_i32_0 : i32, i32
  }
  func.func @transform_9(%arg0: i32) -> (i32, i32) {
    %c0_i32 = arith.constant 0 : i32
    %c0_i32_0 = arith.constant 0 : i32
    %c0_i32_1 = arith.constant 0 : i32
    return %c0_i32, %c0_i32_0 : i32, i32
  }
  func.func @transform_10(%arg0: i32) -> (i32, i32) {
    %c0_i32 = arith.constant 0 : i32
    %c0_i32_0 = arith.constant 0 : i32
    %c0_i32_1 = arith.constant 0 : i32
    return %c0_i32, %c0_i32_0 : i32, i32
  }
  func.func @transform_11(%arg0: i32) -> (i32, i32) {
    %c0_i32 = arith.constant 0 : i32
    %c0_i32_0 = arith.constant 0 : i32
    %c0_i32_1 = arith.constant 0 : i32
    return %c0_i32, %c0_i32_0 : i32, i32
  }
  func.func @transform_12(%arg0: i32) -> (i32, i32) {
    %c0_i32 = arith.constant 0 : i32
    %c0_i32_0 = arith.constant 0 : i32
    return %arg0, %c0_i32 : i32, i32
  }
}

</mosaic_0001>

<bundles_post_ra>
// kernel: encoder_forward.1
= control target key start
LH: loop header
LB: loop body
LE: loop exit
PB: predicated region body
PF: predicated region fallthrough
CT: control target
= control target key end

     0   :  { %17 = vsyncpa [#allocation5], 0  ;;  %s1225_s0 = inlined_call_operand.vmem [shape: f32[4], index: 0, kind: input, shape index: {}]   ;;  %s1226_s1 = inlined_call_operand.vmem [shape: f32[8,32], index: 1, kind: input, shape index: {}]   ;;  %s1227_s2 = inlined_call_operand.hbm [shape: bf16[32,128], index: 2, kind: input, shape index: {}]   ;;  %s1228_s3 = inlined_call_operand.vmem [shape: f32[1,128], index: 3, kind: input, shape index: {}]   ;;  %s1229_s4 = inlined_call_operand.vmem [shape: bf16[128,128], index: 4, kind: input, shape index: {}]   ;;  %s1230_s5 = inlined_call_operand.vmem [shape: f32[1,128], index: 5, kind: input, shape index: {}]   ;;  %s1231_s6 = inlined_call_operand.hbm [shape: bf16[128,128], index: 6, kind: input, shape index: {}]   ;;  %s1232_s7 = inlined_call_operand.vmem [shape: f32[1,128], index: 7, kind: input, shape index: {}]   ;;  %s1233_s8 = inlined_call_operand.hbm [shape: bf16[128,128], index: 8, kind: input, shape index: {}]   ;;  %s1234_s9 = inlined_call_operand.vmem [shape: f32[1,128], index: 9, kind: input, shape index: {}]   ;;  %s1235_s10 = inlined_call_operand.vmem [shape: bf16[128,16], index: 10, kind: input, shape index: {}]   ;;  %s1236_s11 = inlined_call_operand.vmem [shape: f32[1,16], index: 11, kind: input, shape index: {}]   ;;  %s1237_s12 = inlined_call_operand.hbm [shape: f32[8,16], index: 12, kind: output, shape index: {}]  }
   0x1   :  { %18 = vsyncpa [#allocation3], 0 }
   0x2   :  { %19 = vsyncpa [#allocation8], 0 }
   0x3   :  { %20 = vsyncpa [#allocation4], 0  ;;  %s27_s23 = sshll.u32 %s1225_s0, 4  ;;  %s974_s24 = smov [#allocation7]   ;;  %s28_s23 = int_to_ptr.vmem [resolvable:$true] %s27_s23 }
   0x4   :  { %s56_s25 = sshll.u32 %s974_s24, 4  ;;  %s866_s28 = scalar_lea.hbm %s1231_s6, 1024  ;;  %s57_s25 = int_to_ptr.vmem [resolvable:$true] %s56_s25 }
   0x5   :  { %p867_p0 = scmp.ne.s32.totalorder %s1231_s6, %s866_s28  ;;  %p870_p1 = scmp.lt.u32.totalorder %s866_s28, %s1231_s6 }
   0x7   :  { %p872_p2 = pnand %p870_p1, %p867_p0 }
   0x9   :  { %875 = shalt.err (!%p872_p2)
}
   0xa   :  { %s876_s15 = scalar_lea.vmem %s57_s25, 1024  ;;  %p881_p4 = scmp.lt.s32.totalorder %s57_s25, %s57_s25 }
   0xb   :  { %p877_p3 = scmp.ne.s32.totalorder %s57_s25, %s876_s15  ;;  %p882_p5 = scmp.lt.s32.totalorder %s876_s15, %s876_s15 }
   0xd   :  { %p883_p6 = por %p882_p5, %p881_p4 }
   0xf   :  { %p884_p7 = pnand %p883_p6, %p877_p3 }
  0x11   :  { %887 = shalt.err (!%p884_p7)
}
  0x12   :  { %s975_s0 = smov 64   ;;  %s976_s16 = smov 4  }
  0x13   :  { %62 = dma.hbm_to_vmem [thread:$0]  %s1231_s6, 1024, %s57_s25, [#allocation8], %s975_s0, %s975_s0, %s976_s16  }
  0x14   :  { %s888_s19 = scalar_lea.vmem %s28_s23, 16  ;;  %p893_p9 = scmp.lt.s32.totalorder %s28_s23, %s28_s23 }
  0x15   :  { %p889_p8 = scmp.ne.s32.totalorder %s28_s23, %s888_s19  ;;  %p894_p10 = scmp.lt.s32.totalorder %s888_s19, %s888_s19 }
  0x17   :  { %p895_p11 = por %p894_p10, %p893_p9 }
  0x19   :  { %p896_p12 = pnand %p895_p11, %p889_p8 }
  0x1b   :  { %899 = shalt.err (!%p896_p12)
}
  0x1c   :  { %s977_s20 = smov [#allocation2]   ;;  %s978_s21 = smov [#allocation6]  }
  0x1d   :  { %30 = dma.vmem_to_smem %s28_s23, 16, %s977_s20, [#allocation5]  }
  0x1e   :  { %s38_s22 = sshll.u32 %s978_s21, 4  ;;  %s979_s24 = smov [#allocation9]   ;;  %s39_s22 = int_to_ptr.vmem [resolvable:$true] %s38_s22 }
  0x1f   :  { %s70_s26 = sshll.u32 %s979_s24, 4  ;;  %s900_s6 = scalar_lea.hbm %s1227_s2, 256  ;;  %s1066_s26 = int_to_ptr.vmem [resolvable:$true] %s70_s26 }
  0x20   :  { %p901_p13 = scmp.ne.s32.totalorder %s1227_s2, %s900_s6  ;;  %p904_p0 = scmp.lt.u32.totalorder %s900_s6, %s1227_s2 }
  0x22   :  { %p906_p1 = pnand %p904_p0, %p901_p13 }
  0x24   :  { %909 = shalt.err (!%p906_p1)
}
  0x25   :  { %s910_s23 = scalar_lea.vmem %s39_s22, 256  ;;  %p915_p3 = scmp.lt.s32.totalorder %s39_s22, %s39_s22 }
  0x26   :  { %p911_p2 = scmp.ne.s32.totalorder %s39_s22, %s910_s23  ;;  %p916_p4 = scmp.lt.s32.totalorder %s910_s23, %s910_s23 }
  0x28   :  { %p917_p5 = por %p916_p4, %p915_p3 }
  0x2a   :  { %p918_p6 = pnand %p917_p5, %p911_p2 }
  0x2c   :  { %921 = shalt.err (!%p918_p6)
}
  0x2d   :  { %44 = dma.hbm_to_vmem [thread:$0]  %s1227_s2, 256, %s39_s22, [#allocation3], %s975_s0, %s975_s0, %s976_s16  }
  0x2e   :  { %s922_s19 = scalar_lea.hbm %s1233_s8, 1024 }
  0x2f   :  { %p923_p7 = scmp.ne.s32.totalorder %s1233_s8, %s922_s19  ;;  %p926_p8 = scmp.lt.u32.totalorder %s922_s19, %s1233_s8 }
  0x31   :  { %p928_p9 = pnand %p926_p8, %p923_p7 }
  0x33   :  { %931 = shalt.err (!%p928_p9)
}
  0x34   :  { %s932_s28 = scalar_lea.vmem %s1066_s26, 1024  ;;  %p937_p11 = scmp.lt.s32.totalorder %s1066_s26, %s1066_s26 }
  0x35   :  { %p933_p10 = scmp.ne.s32.totalorder %s1066_s26, %s932_s28  ;;  %p938_p12 = scmp.lt.s32.totalorder %s932_s28, %s932_s28 }
  0x37   :  { %p939_p13 = por %p938_p12, %p937_p11 }
  0x39   :  { %p940_p0 = pnand %p939_p13, %p933_p10 }
  0x3b   :  { %943 = shalt.err (!%p940_p0)
}
  0x3c   :  { %76 = dma.hbm_to_vmem [thread:$0]  %s1233_s8, 1024, %s1066_s26, [#allocation8], %s975_s0, %s975_s0, %s976_s16  }
  0x3d   :  { %966 = dma.done.wait [#allocation5], 16  }
  0x3e   :  { %967 = vsyncadd [#allocation5], 4294967280 }
  0x3f   :  { %968 = dma.done.wait [#allocation3], 256  }
  0x40   :  { %969 = vsyncadd [#allocation3], 4294967040 }
  0x41   :  { %970 = dma.done.wait [#allocation8], 2048  }
  0x42   :  { %971 = vsyncadd [#allocation8], 4294965248 }
  0x43   :  { %95 = sfence }
  0x44   :  { %v832_v0 = vld [vmem:[#allocation6] sm:$0xff]   ;;  %v980_v1 = vmov 0.0   ;;  %v833_v2 = vld [vmem:[#allocation6 + $0x8] sm:$0xff]   ;;  %vm981_vm0 = vmmov 0   ;;  %vm122_vm1 = vcmask 261120   ;;  %v836_v7 = vld [vmem:[%s1229_s4 + $0x10] sm:$0xff]  }
  0x45   :  { %735 = vmatprep.subr.bf16.mxu0 %v980_v1  ;;  %743 = vmatprep.subr.bf16.mxu1 %v980_v1  ;;  %v97_v3 = vld [vmem:[%s1226_s1] sm:$0xff]  ;;  %v835_v6 = vld [vmem:[%s1229_s4 + $0x8] sm:$0xff]   ;;  %v837_v8 = vld [vmem:[%s1229_s4 + $0x18] sm:$0xff]   ;;  %s676_s23 = sld [smem:[#allocation2 + $0x2]]  ;;  %s686_s20 = sld [smem:[#allocation2 + $0x3]]  ;;  %vm634_vm6 = vcmask 130048  }
  0x46   :  { %736 = vmatpush3.bf16.msra.mxu0 %v832_v0  ;;  %739 = vmatprep.mubr.msk.bf16.mxu0 %vm981_vm0, %v980_v1  ;;  %v834_v4 = vld [vmem:[%s1229_s4] sm:$0xff]   ;;  %v98_v5 = vpack.c.bf16 %v97_v3, %v97_v3  ;;  %v839_v10 = vld [vmem:[%s1229_s4 + $0x28] sm:$0xff]   ;;  %v840_v11 = vld [vmem:[%s1229_s4 + $0x30] sm:$0xff]  }
  0x47   :  { %737 = vmatprep.subr.bf16.mxu0 %v980_v1  ;;  %759 = vmatprep.mubr.msk.bf16.mxu1 %vm981_vm0, %v980_v1  ;;  %v838_v9 = vld [vmem:[%s1229_s4 + $0x20] sm:$0xff]   ;;  %v841_v12 = vld [vmem:[%s1229_s4 + $0x38] sm:$0xff]   ;;  %v842_v13 = vld [vmem:[#allocation7] sm:$0xff]   ;;  %s166_s4 = sld [smem:[#allocation2]] }
  0x48   :  { %744 = vmatpush3.bf16.msra.mxu1 %v834_v4  ;;  %v843_v14 = vld [vmem:[#allocation7 + $0x8] sm:$0xff]   ;;  %v844_v15 = vld [vmem:[#allocation7 + $0x10] sm:$0xff]   ;;  %v845_v16 = vld [vmem:[#allocation7 + $0x18] sm:$0xff]  }
  0x49   :  { %745 = vmatprep.subr.bf16.mxu1 %v980_v1  ;;  %v846_v17 = vld [vmem:[#allocation7 + $0x20] sm:$0xff]   ;;  %v847_v18 = vld [vmem:[#allocation7 + $0x28] sm:$0xff]   ;;  %v653_v19 = vld [vmem:[%s1228_s3] ss:$0 sm:$0xff]  ;;  %s666_s3 = sld [smem:[#allocation2 + $0x1]] }
  0x4a   :  { %738 = vmatpush3.bf16.msra.mxu0 %v833_v2  ;;  %v848_v29 = vld [vmem:[#allocation7 + $0x30] sm:$0xff]   ;;  %v849_v30 = vld [vmem:[#allocation7 + $0x38] sm:$0xff]   ;;  %v850_v31 = vld [vmem:[#allocation9] sm:$0xff]  }
  0x4b   :  { %763 = vmatprep.subr.bf16.mxu0 %v980_v1  ;;  %v851_v32 = vld [vmem:[#allocation9 + $0x8] sm:$0xff]   ;;  %v852_v33 = vld [vmem:[#allocation9 + $0x10] sm:$0xff]   ;;  %v853_v34 = vld [vmem:[#allocation9 + $0x18] sm:$0xff]   ;;  %v402_v57 = vstv %s676_s23 }
  0x4c   :  { %746 = vmatpush3.bf16.msra.mxu1 %v835_v6  ;;  %v854_v35 = vld [vmem:[#allocation9 + $0x20] sm:$0xff]   ;;  %v855_v36 = vld [vmem:[#allocation9 + $0x28] sm:$0xff]   ;;  %v657_v37 = vld [vmem:[%s1230_s5] ss:$0 sm:$0xff]  ;;  %v519_v6 = vstv %s686_s20 }
  0x4d   :  { %740 = vmatmul.mubr.msk.bf16.vlgmr.msra.gmra.mrb[0].mxu0 %vm122_vm1, %v98_v5  ;;  %747 = vmatprep.subr.bf16.mxu1 %v980_v1  ;;  %v168_v21 = vstv %s166_s4  ;;  %v856_v47 = vld [vmem:[#allocation9 + $0x30] sm:$0xff]   ;;  %v857_v48 = vld [vmem:[#allocation9 + $0x38] sm:$0xff]   ;;  %v860_v51 = vld [vmem:[%s1235_s10 + $0x10] sm:$0xff]  }
  0x4e   :  { %779 = vmatprep.mubr.msk.bf16.mxu0 %vm981_vm0, %v980_v1  ;;  %764 = vmatpush3.bf16.msra.mxu0 %v842_v13  ;;  %v858_v49 = vld [vmem:[%s1235_s10] sm:$0xff]   ;;  %v859_v50 = vld [vmem:[%s1235_s10 + $0x8] sm:$0xff]   ;;  %v861_v52 = vld [vmem:[%s1235_s10 + $0x18] sm:$0xff]  }
  0x4f   :  { %765 = vmatprep.subr.bf16.mxu0 %v980_v1  ;;  %v285_v39 = vstv %s666_s3  ;;  %v862_v53 = vld [vmem:[%s1235_s10 + $0x20] sm:$0xff]   ;;  %v863_v54 = vld [vmem:[%s1235_s10 + $0x28] sm:$0xff]   ;;  %v864_v2 = vld [vmem:[%s1235_s10 + $0x30] sm:$0xff]  }
  0x50   :  { %748 = vmatpush3.bf16.msra.mxu1 %v836_v7  ;;  %v667_v55 = vld [vmem:[%s1232_s7] ss:$0 sm:$0xff]  ;;  %v865_v3 = vld [vmem:[%s1235_s10 + $0x38] sm:$0xff]   ;;  %s982_s10 = smov [#allocation10]  }
  0x51   :  { %749 = vmatprep.subr.bf16.mxu1 %v980_v1  ;;  %v677_v4 = vld [vmem:[%s1234_s9] ss:$0 sm:$0xff]  ;;  %s642_s3 = sshll.u32 %s982_s10, 4  ;;  %s643_s3 = int_to_ptr.vmem [resolvable:$true] %s642_s3 }
  0x52   :  { %766 = vmatpush3.bf16.msra.mxu0 %v843_v14  ;;  %v687_v13 = vld [vmem:[%s1236_s11] ss:$0 sm:$0xff]  ;;  %s944_s9 = scalar_lea.vmem %s643_s3, 128  ;;  %p949_p2 = scmp.lt.s32.totalorder %s643_s3, %s643_s3 }
  0x53   :  { %767 = vmatprep.subr.bf16.mxu0 %v980_v1  ;;  %p945_p1 = scmp.ne.s32.totalorder %s643_s3, %s944_s9  ;;  %p950_p3 = scmp.lt.s32.totalorder %s944_s9, %s944_s9 }
  0x54   :  { %750 = vmatpush3.bf16.msra.mxu1 %v837_v8 }
  0x55   :  { %751 = vmatprep.subr.bf16.mxu1 %v980_v1  ;;  %p951_p4 = por %p950_p3, %p949_p2 }
  0x56   :  { %768 = vmatpush3.bf16.msra.mxu0 %v844_v15 }
  0x57   :  { %769 = vmatprep.subr.bf16.mxu0 %v980_v1  ;;  %p952_p5 = pnand %p951_p4, %p945_p1 }
  0x58   :  { %752 = vmatpush3.bf16.msra.mxu1 %v838_v9 }
  0x59   :  { %753 = vmatprep.subr.bf16.mxu1 %v980_v1 }
  0x5a   :  { %770 = vmatpush3.bf16.msra.mxu0 %v845_v16 }
  0x5b   :  { %771 = vmatprep.subr.bf16.mxu0 %v980_v1 }
  0x5c   :  { %754 = vmatpush3.bf16.msra.mxu1 %v839_v10 }
  0x5d   :  { %755 = vmatprep.subr.bf16.mxu1 %v980_v1 }
  0x5e   :  { %772 = vmatpush3.bf16.msra.mxu0 %v846_v17 }
  0x5f   :  { %773 = vmatprep.subr.bf16.mxu0 %v980_v1 }
  0x60   :  { %756 = vmatpush3.bf16.msra.mxu1 %v840_v11 }
  0x61   :  { %757 = vmatprep.subr.bf16.mxu1 %v980_v1 }
  0x62   :  { %774 = vmatpush3.bf16.msra.mxu0 %v847_v18 }
  0x63   :  { %775 = vmatprep.subr.bf16.mxu0 %v980_v1 }
  0x64   :  { %758 = vmatpush3.bf16.msra.mxu1 %v841_v12 }
  0x65   :  { %783 = vmatprep.subr.bf16.mxu1 %v980_v1 }
  0x66   :  { %776 = vmatpush3.bf16.msra.mxu0 %v848_v29 }
  0x67   :  { %777 = vmatprep.subr.bf16.mxu0 %v980_v1 }
  0x6a   :  { %778 = vmatpush3.bf16.msra.mxu0 %v849_v30 }
  0x6b   :  { %803 = vmatprep.subr.bf16.mxu0 %v980_v1 }
 0x120   :  { %v160_v20 = vpop.f32.mrb[0].mxu0 }
 0x121   :  { %v161_v22 = vadd.f32 %v653_v19, %v160_v20  ;;  %v741_v23 = vpop.f32.mrb[1].mxu0 }
 0x122   :  { %v163_v24 = vpop.f32.mrb[2].mxu0 }
 0x123   :  { %vm167_vm2 = vcmp.gt.f32.partialorder %v161_v22, 0.0  ;;  %v169_v25 = vmul.f32 %v168_v21, %v161_v22  ;;  %v742_v26 = vpop.f32.mrb[3].mxu0 }
 0x125   :  { %v170_v27 = vsel %vm167_vm2, %v161_v22, %v169_v25 }
 0x126   :  { %v171_v28 = vpack.c.bf16 %v170_v27, %v170_v27 }
 0x128   :  { %760 = vmatmul.mubr.bf16.vlgmr.msra.gmra.mrb[0].mxu1 %v171_v28 }
 0x129   :  { %799 = vmatprep.mubr.msk.bf16.mxu1 %vm981_vm0, %v980_v1  ;;  %784 = vmatpush3.bf16.msra.mxu1 %v850_v31 }
 0x12a   :  { %785 = vmatprep.subr.bf16.mxu1 %v980_v1 }
 0x12d   :  { %786 = vmatpush3.bf16.msra.mxu1 %v851_v32 }
 0x12e   :  { %787 = vmatprep.subr.bf16.mxu1 %v980_v1 }
 0x131   :  { %788 = vmatpush3.bf16.msra.mxu1 %v852_v33 }
 0x132   :  { %789 = vmatprep.subr.bf16.mxu1 %v980_v1 }
 0x135   :  { %790 = vmatpush3.bf16.msra.mxu1 %v853_v34 }
 0x136   :  { %791 = vmatprep.subr.bf16.mxu1 %v980_v1 }
 0x139   :  { %792 = vmatpush3.bf16.msra.mxu1 %v854_v35 }
 0x13a   :  { %793 = vmatprep.subr.bf16.mxu1 %v980_v1 }
 0x13d   :  { %794 = vmatpush3.bf16.msra.mxu1 %v855_v36 }
 0x13e   :  { %795 = vmatprep.subr.bf16.mxu1 %v980_v1 }
 0x141   :  { %796 = vmatpush3.bf16.msra.mxu1 %v856_v47 }
 0x142   :  { %797 = vmatprep.subr.bf16.mxu1 %v980_v1 }
 0x145   :  { %798 = vmatpush3.bf16.msra.mxu1 %v857_v48 }
 0x1fb   :  { %v277_v38 = vpop.f32.mrb[0].mxu1 }
 0x1fc   :  { %v278_v40 = vadd.f32 %v657_v37, %v277_v38  ;;  %v761_v41 = vpop.f32.mrb[1].mxu1 }
 0x1fd   :  { %v280_v42 = vpop.f32.mrb[2].mxu1 }
 0x1fe   :  { %vm284_vm3 = vcmp.gt.f32.partialorder %v278_v40, 0.0  ;;  %v286_v43 = vmul.f32 %v285_v39, %v278_v40  ;;  %v762_v44 = vpop.f32.mrb[3].mxu1 }
 0x200   :  { %v287_v45 = vsel %vm284_vm3, %v278_v40, %v286_v43 }
 0x201   :  { %v288_v46 = vpack.c.bf16 %v287_v45, %v287_v45 }
 0x203   :  { %780 = vmatmul.mubr.bf16.vlgmr.msra.gmra.mrb[4].mxu0 %v288_v46 }
 0x204   :  { %819 = vmatprep.mubr.msk.bf16.mxu0 %vm981_vm0, %v980_v1  ;;  %804 = vmatpush3.bf16.msra.mxu0 %v858_v49 }
 0x205   :  { %805 = vmatprep.subr.bf16.mxu0 %v980_v1 }
 0x208   :  { %806 = vmatpush3.bf16.msra.mxu0 %v859_v50 }
 0x209   :  { %807 = vmatprep.subr.bf16.mxu0 %v980_v1 }
 0x20c   :  { %808 = vmatpush3.bf16.msra.mxu0 %v860_v51 }
 0x20d   :  { %809 = vmatprep.subr.bf16.mxu0 %v980_v1 }
 0x210   :  { %810 = vmatpush3.bf16.msra.mxu0 %v861_v52 }
 0x211   :  { %811 = vmatprep.subr.bf16.mxu0 %v980_v1 }
 0x214   :  { %812 = vmatpush3.bf16.msra.mxu0 %v862_v53 }
 0x215   :  { %813 = vmatprep.subr.bf16.mxu0 %v980_v1 }
 0x218   :  { %814 = vmatpush3.bf16.msra.mxu0 %v863_v54 }
 0x219   :  { %815 = vmatprep.subr.bf16.mxu0 %v980_v1 }
 0x21c   :  { %816 = vmatpush3.bf16.msra.mxu0 %v864_v2 }
 0x21d   :  { %817 = vmatprep.subr.bf16.mxu0 %v980_v1 }
 0x220   :  { %818 = vmatpush3.bf16.msra.mxu0 %v865_v3 }
 0x2d6   :  { %v394_v56 = vpop.f32.mrb[4].mxu0 }
 0x2d7   :  { %v395_v58 = vadd.f32 %v667_v55, %v394_v56  ;;  %v781_v59 = vpop.f32.mrb[5].mxu0 }
 0x2d8   :  { %v397_v60 = vpop.f32.mrb[6].mxu0 }
 0x2d9   :  { %vm401_vm4 = vcmp.gt.f32.partialorder %v395_v58, 0.0  ;;  %v403_v61 = vmul.f32 %v402_v57, %v395_v58  ;;  %v782_v62 = vpop.f32.mrb[7].mxu0 }
 0x2db   :  { %v404_v63 = vsel %vm401_vm4, %v395_v58, %v403_v61 }
 0x2dc   :  { %v405_v0 = vpack.c.bf16 %v404_v63, %v404_v63 }
 0x2de   :  { %800 = vmatmul.mubr.bf16.vlgmr.msra.gmra.mrb[4].mxu1 %v405_v0 }
 0x3b1   :  { %v511_v5 = vpop.f32.mrb[4].mxu1 }
 0x3b2   :  { %v512_v7 = vadd.f32 %v677_v4, %v511_v5  ;;  %v801_v8 = vpop.f32.mrb[5].mxu1 }
 0x3b3   :  { %v514_v9 = vpop.f32.mrb[6].mxu1 }
 0x3b4   :  { %vm518_vm5 = vcmp.gt.f32.partialorder %v512_v7, 0.0  ;;  %v520_v10 = vmul.f32 %v519_v6, %v512_v7  ;;  %v802_v11 = vpop.f32.mrb[7].mxu1 }
 0x3b6   :  { %v521_v12 = vsel %vm518_vm5, %v512_v7, %v520_v10 }
 0x3b7   :  { %v522_v1 = vpack.c.bf16 %v521_v12, %v521_v12 }
 0x3b9   :  { %820 = vmatmul.mubr.bf16.vlgmr.msra.gmra.mrb[8].mxu0 %v522_v1 }
 0x48c   :  { %v628_v14 = vpop.f32.mrb[8].mxu0 }
 0x48d   :  { %v629_v15 = vadd.f32 %v687_v13, %v628_v14  ;;  %v821_v16 = vpop.f32.mrb[9].mxu0 }
 0x48e   :  { %v631_v17 = vpop.f32.mrb[10].mxu0 }
 0x48f   :  { %v822_v18 = vpop.f32.mrb[11].mxu0  ;;  %635 = vst.msk [vmem:[#allocation10] sm:$0xff] %vm634_vm6, %v629_v15 }
 0x490   :  { %955 = shalt.err (!%p952_p5)
}
 0x491   :  { %s956_s11 = scalar_lea.hbm %s1237_s12, 128 }
 0x492   :  { %p957_p6 = scmp.ne.s32.totalorder %s1237_s12, %s956_s11  ;;  %p960_p7 = scmp.lt.u32.totalorder %s956_s11, %s1237_s12 }
 0x494   :  { %p962_p8 = pnand %p960_p7, %p957_p6 }
 0x496   :  { %965 = shalt.err (!%p962_p8)
}
 0x497   :  { %645 = dma.vmem_to_hbm [thread:$0]  %s643_s3, 128, %s1237_s12, [#allocation4]  }
 0x498   :  { %972 = dma.done.wait [#allocation4], 128  }
 0x499   :  { %973 = vsyncadd [#allocation4], 4294967168 }
 0x49a   :  { %649 = vsyncpa [#allocation3], 1 }
 0x49b   :  { %650 = vsyncpa [#allocation8], 1 }
 0x49c   :  { %651 = vsyncpa [#allocation4], 1 }
 0x49d   :  { %652 = vsyncpa [#allocation5], 1 }

</bundles_post_ra>
